<compile_context>
chip_gen: v5e
topology: v5e:2x2
jax: 0.10.0
libtpu: 0.0.40
codegen_flags: <defaults>
</compile_context>

<pallas_src>
import jax
import jax.numpy as jnp
from jax import lax
from jax.experimental import pallas as pl
from jax.experimental.pallas import tpu as pltpu

C_IN, C_MID, C_OUT = 4, 8, 8
KH = KW = 3


# ----------------------------------------------------------------------------
# Kernel
# ----------------------------------------------------------------------------
def _shift_rows(p, d):
    """Return q with q[h] = p[h + d], zero-filled where h + d is out of range."""
    if d == 0:
        return p
    _, c = p.shape
    zero = jnp.zeros((abs(d), c), p.dtype)
    if d > 0:
        return jnp.concatenate([p[d:], zero], axis=0)
    return jnp.concatenate([zero, p[:d]], axis=0)


def _conv_rows(src, m_ref):
    """3x3 'SAME' conv of one image with rows flattened as (H, W*Cin).

    m_ref[kh] is a (W*Cin, W*Cout) block-Toeplitz matrix carrying the kw taps
    and the W-direction zero padding; the H-direction halo is handled by
    shifting the per-kh matmul results by kh - 1 rows (pure register work).
    """
    h = src.shape[0]
    acc = jnp.zeros((h, m_ref.shape[2]), jnp.float32)
    for kh in range(KH):
        p = jnp.dot(src, m_ref[kh], preferred_element_type=jnp.float32)
        acc = acc + _shift_rows(p, kh - 1)
    return acc


def resblock_kernel(x_ref, m1_ref, b1_ref, m2_ref, b2_ref, msk_ref, o_ref):
    x = x_ref[0]                                          # (H, W*C_IN) bf16

    # conv1 (+ folded BN1 scale), BN1 shift, ReLU   -> (H, W*C_MID) f32
    y1 = jnp.maximum(_conv_rows(x, m1_ref) + b1_ref[...], 0.0)

    # conv2 (+ folded BN2 scale), BN2 shift         -> (H, W*C_OUT) f32
    y2 = _conv_rows(y1.astype(jnp.bfloat16), m2_ref) + b2_ref[...]

    # skip = 1x1 conv as a block-diagonal lane-dense matmul on the raw input.
    sk = jnp.dot(x, msk_ref[...], preferred_element_type=jnp.float32)

    # activation_before_skip = False -> final ReLU after the residual add.
    o_ref[0] = jnp.maximum(sk + y2, 0.0)


# ----------------------------------------------------------------------------
# Wrapper: weight preparation (BN fold + block-Toeplitz) and pallas_call
# ----------------------------------------------------------------------------
def build_row_toeplitz(w, width):
    """(KH, KW, Cin, Cout) conv weights -> (KH, W*Cin, W*Cout) Toeplitz mats.

    M[kh, wi*Cin + ci, w*Cout + co] = w[kh, kw, ci, co]  where wi = w + kw - 1
    and entries with wi outside [0, W) are zero (== 'SAME' zero padding in W).
    """
    kh_, kw_, _, _ = w.shape
    wi = jnp.arange(width)[:, None]
    wo = jnp.arange(width)[None, :]
    m = None
    for kw in range(kw_):
        mask = (wi == wo + kw - 1).astype(w.dtype)        # (W, W)
        term = jnp.einsum("ab,kio->kaibo", mask, w[:, kw])
        m = term if m is None else m + term
    return m.reshape(kh_, width * w.shape[2], width * w.shape[3])


def build_skip_matrix(wskip, width):
    """(Cin, Cout) 1x1-conv weights -> block-diagonal (W*Cin, W*Cout)."""
    eye = jnp.eye(width, dtype=wskip.dtype)
    return jnp.einsum("ab,io->aibo", eye, wskip).reshape(
        width * wskip.shape[0], width * wskip.shape[1])


def prepare_weights(params, width):
    s1 = params["s1"].reshape(-1)
    b1 = params["b1"].reshape(-1)
    s2 = params["s2"].reshape(-1)
    b2 = params["b2"].reshape(-1)
    # Fold BN scales into conv weights (exact: per-output-channel).
    w1f = params["w1"] * s1
    w2f = params["w2"] * s2
    m1 = build_row_toeplitz(w1f, width).astype(jnp.bfloat16)
    m2 = build_row_toeplitz(w2f, width).astype(jnp.bfloat16)
    msk = build_skip_matrix(params["wskip"], width).astype(jnp.bfloat16)
    b1r = jnp.tile(b1, width).reshape(1, width * C_MID).astype(jnp.float32)
    b2r = jnp.tile(b2, width).reshape(1, width * C_OUT).astype(jnp.float32)
    return m1, b1r, m2, b2r, msk


def resblock_forward(x_nchw, params):
    n, c, h, w = x_nchw.shape
    assert c == C_IN
    wcin, wcmid, wcout = w * C_IN, w * C_MID, w * C_OUT

    # NCHW -> NHWC -> (N, H, W*Cin), bf16.  (Transpose kept for the PyTorch
    # NCHW interface; the reshape itself is free.)
    x = jnp.transpose(x_nchw, (0, 2, 3, 1)).reshape(n, h, wcin)
    x = x.astype(jnp.bfloat16)

    m1, b1r, m2, b2r, msk = prepare_weights(params, w)

    out = pl.pallas_call(
        resblock_kernel,
        out_shape=jax.ShapeDtypeStruct((n, h, wcout), jnp.float32),
        grid_spec=pltpu.PrefetchScalarGridSpec(
            num_scalar_prefetch=0,
            grid=(n,),
            in_specs=[
                pl.BlockSpec((1, h, wcin), lambda i: (i, 0, 0)),
                pl.BlockSpec((KH, wcin, wcmid), lambda i: (0, 0, 0)),
                pl.BlockSpec((1, wcmid), lambda i: (0, 0)),
                pl.BlockSpec((KH, wcmid, wcout), lambda i: (0, 0, 0)),
                pl.BlockSpec((1, wcout), lambda i: (0, 0)),
                pl.BlockSpec((wcin, wcout), lambda i: (0, 0)),
            ],
            out_specs=pl.BlockSpec((1, h, wcout), lambda i: (i, 0, 0)),
        ),
        compiler_params=pltpu.CompilerParams(
            dimension_semantics=("parallel",),
            vmem_limit_bytes=32 * 1024 * 1024,
        ),
    )(x, m1, b1r, m2, b2r, msk)

    # (N, H, W*Cout) -> NHWC -> NCHW
    return jnp.transpose(out.reshape(n, h, w, C_OUT), (0, 3, 1, 2))


# ----------------------------------------------------------------------------
# Parameters and pure-JAX reference (mirrors the kernel's bf16/f32 numerics)
# ----------------------------------------------------------------------------
def fold_bn(gamma, beta, mean, var, eps=1e-5):
    scale = gamma / jnp.sqrt(var + eps)
    shift = beta - mean * scale
    return scale.reshape(1, -1), shift.reshape(1, -1)


def init_params(key):
    ks = jax.random.split(key, 12)
    w1 = 0.1 * jax.random.normal(ks[0], (KH, KW, C_IN, C_MID), jnp.float32)
    w2 = 0.1 * jax.random.normal(ks[1], (KH, KW, C_MID, C_OUT), jnp.float32)
    wskip = 0.1 * jax.random.normal(ks[2], (C_IN, C_OUT), jnp.float32)

    g1 = 1.0 + 0.1 * jax.random.normal(ks[3], (C_MID,), jnp.float32)
    be1 = 0.1 * jax.random.normal(ks[4], (C_MID,), jnp.float32)
    rm1 = 0.1 * jax.random.normal(ks[5], (C_MID,), jnp.float32)
    rv1 = jax.random.uniform(ks[6], (C_MID,), jnp.float32, 0.5, 1.5)

    g2 = 1.0 + 0.1 * jax.random.normal(ks[7], (C_OUT,), jnp.float32)
    be2 = 0.1 * jax.random.normal(ks[8], (C_OUT,), jnp.float32)
    rm2 = 0.1 * jax.random.normal(ks[9], (C_OUT,), jnp.float32)
    rv2 = jax.random.uniform(ks[10], (C_OUT,), jnp.float32, 0.5, 1.5)

    s1, b1 = fold_bn(g1, be1, rm1, rv1)
    s2, b2 = fold_bn(g2, be2, rm2, rv2)
    return dict(w1=w1, s1=s1, b1=b1, w2=w2, s2=s2, b2=b2, wskip=wskip)


def resblock_reference(x_nchw, params):
    # Mirrors the module forward with the same deliberate precision choices as
    # the kernel: BN scale folded into weights, bf16-rounded x / weights /
    # intermediate activation, f32 accumulation and epilogue.
    s1 = params["s1"].reshape(-1)
    b1 = params["b1"].reshape(-1)
    s2 = params["s2"].reshape(-1)
    b2 = params["b2"].reshape(-1)
    w1f = (params["w1"] * s1).astype(jnp.bfloat16).astype(jnp.float32)
    w2f = (params["w2"] * s2).astype(jnp.bfloat16).astype(jnp.float32)
    wsk = params["wskip"].astype(jnp.bfloat16).astype(jnp.float32)

    x = jnp.transpose(x_nchw, (0, 2, 3, 1))
    x = x.astype(jnp.bfloat16).astype(jnp.float32)

    dn = ("NHWC", "HWIO", "NHWC")
    y = lax.conv_general_dilated(
        x, w1f, (1, 1), "SAME",
        dimension_numbers=lax.conv_dimension_numbers(x.shape, w1f.shape, dn))
    y = jnp.maximum(y + b1, 0.0)
    y = y.astype(jnp.bfloat16).astype(jnp.float32)
    y = lax.conv_general_dilated(
        y, w2f, (1, 1), "SAME",
        dimension_numbers=lax.conv_dimension_numbers(y.shape, w2f.shape, dn))
    y = y + b2
    sk = jnp.einsum("nhwc,cd->nhwd", x, wsk)
    z = jnp.maximum(sk + y, 0.0)
    return jnp.transpose(z, (0, 3, 1, 2))


if __name__ == "__main__":
    key = jax.random.PRNGKey(0)
    kx, kp = jax.random.split(key)
    x = jax.random.normal(kx, (2, C_IN, 16, 16), jnp.float32)   # NCHW input
    params = init_params(kp)

    out = jax.block_until_ready(resblock_forward(x, params))
    ref = jax.block_until_ready(resblock_reference(x, params))

    assert out.shape == (2, C_OUT, 16, 16)
    err = jnp.max(jnp.abs(out - ref))
    assert jnp.allclose(out, ref, atol=1e-2, rtol=1e-2), f"max abs err = {err}"
    print("KERNEL_OK")
</pallas_src>

<mosaic_0001>
module attributes {stable_mosaic.version = 11 : i64} {
  func.func @resblock_kernel(%arg0: i32, %arg1: memref<1x16x64xbf16, #tpu.memory_space<vmem>>, %arg2: memref<3x64x128xbf16, #tpu.memory_space<vmem>>, %arg3: memref<1x128xf32, #tpu.memory_space<vmem>>, %arg4: memref<3x128x128xbf16, #tpu.memory_space<vmem>>, %arg5: memref<1x128xf32, #tpu.memory_space<vmem>>, %arg6: memref<64x128xbf16, #tpu.memory_space<vmem>>, %arg7: memref<1x16x128xf32, #tpu.memory_space<vmem>>) attributes {dimension_semantics = [#tpu.dimension_semantics<parallel>], iteration_bounds = array<i64: 2>, scalar_prefetch = 0 : i64, scratch_operands = 0 : i64, tpu.core_type = #tpu.core_type<tc>, window_params = [{transform_indices = @transform_0, window_bounds = array<i64: 1, 16, 64>}, {pipeline_mode = #tpu.pipeline_mode<synchronous>, transform_indices = @transform_1, window_bounds = array<i64: 3, 64, 128>}, {pipeline_mode = #tpu.pipeline_mode<synchronous>, transform_indices = @transform_2, window_bounds = array<i64: 1, 128>}, {pipeline_mode = #tpu.pipeline_mode<synchronous>, transform_indices = @transform_3, window_bounds = array<i64: 3, 128, 128>}, {pipeline_mode = #tpu.pipeline_mode<synchronous>, transform_indices = @transform_4, window_bounds = array<i64: 1, 128>}, {pipeline_mode = #tpu.pipeline_mode<synchronous>, transform_indices = @transform_5, window_bounds = array<i64: 64, 128>}, {transform_indices = @transform_6, window_bounds = array<i64: 1, 16, 128>}]} {
    %c0 = arith.constant 0 : index
    %c0_0 = arith.constant 0 : index
    %c0_1 = arith.constant 0 : index
    %0 = vector.load %arg1[%c0, %c0_0, %c0_1] : memref<1x16x64xbf16, #tpu.memory_space<vmem>>, vector<1x16x64xbf16>
    %1 = vector.shape_cast %0 : vector<1x16x64xbf16> to vector<16x64xbf16>
    %cst = arith.constant 0.000000e+00 : f32
    %2 = vector.broadcast %cst : f32 to vector<16x128xf32>
    %c0_2 = arith.constant 0 : index
    %c0_3 = arith.constant 0 : index
    %c0_4 = arith.constant 0 : index
    %3 = vector.load %arg2[%c0_2, %c0_3, %c0_4] : memref<3x64x128xbf16, #tpu.memory_space<vmem>>, vector<1x64x128xbf16>
    %4 = vector.shape_cast %3 : vector<1x64x128xbf16> to vector<64x128xbf16>
    %cst_5 = arith.constant dense<0.000000e+00> : vector<16x128xf32>
    %5 = tpu.matmul %1, %4, %cst_5 {dimension_numbers = #tpu.dot_dimension_numbers<[1], [0], [0], [1], [0, 0, 1, 1], [], []>} : vector<16x64xbf16>, vector<64x128xbf16>, vector<16x128xf32> -> vector<16x128xf32>
    %cst_6 = arith.constant 0.000000e+00 : f32
    %6 = vector.broadcast %cst_6 : f32 to vector<1x128xf32>
    %7 = vector.extract_strided_slice %5 {offsets = [0, 0], sizes = [15, 128], strides = [1, 1]} : vector<16x128xf32> to vector<15x128xf32>
    %8 = tpu.concatenate %6, %7 in 0 : vector<1x128xf32>, vector<15x128xf32> -> vector<16x128xf32>
    %9 = arith.addf %2, %8 : vector<16x128xf32>
    %c1 = arith.constant 1 : index
    %c0_7 = arith.constant 0 : index
    %c0_8 = arith.constant 0 : index
    %10 = vector.load %arg2[%c1, %c0_7, %c0_8] : memref<3x64x128xbf16, #tpu.memory_space<vmem>>, vector<1x64x128xbf16>
    %11 = vector.shape_cast %10 : vector<1x64x128xbf16> to vector<64x128xbf16>
    %cst_9 = arith.constant dense<0.000000e+00> : vector<16x128xf32>
    %12 = tpu.matmul %1, %11, %cst_9 {dimension_numbers = #tpu.dot_dimension_numbers<[1], [0], [0], [1], [0, 0, 1, 1], [], []>} : vector<16x64xbf16>, vector<64x128xbf16>, vector<16x128xf32> -> vector<16x128xf32>
    %13 = arith.addf %9, %12 : vector<16x128xf32>
    %c2 = arith.constant 2 : index
    %c0_10 = arith.constant 0 : index
    %c0_11 = arith.constant 0 : index
    %14 = vector.load %arg2[%c2, %c0_10, %c0_11] : memref<3x64x128xbf16, #tpu.memory_space<vmem>>, vector<1x64x128xbf16>
    %15 = vector.shape_cast %14 : vector<1x64x128xbf16> to vector<64x128xbf16>
    %cst_12 = arith.constant dense<0.000000e+00> : vector<16x128xf32>
    %16 = tpu.matmul %1, %15, %cst_12 {dimension_numbers = #tpu.dot_dimension_numbers<[1], [0], [0], [1], [0, 0, 1, 1], [], []>} : vector<16x64xbf16>, vector<64x128xbf16>, vector<16x128xf32> -> vector<16x128xf32>
    %cst_13 = arith.constant 0.000000e+00 : f32
    %17 = vector.broadcast %cst_13 : f32 to vector<1x128xf32>
    %18 = vector.extract_strided_slice %16 {offsets = [1, 0], sizes = [15, 128], strides = [1, 1]} : vector<16x128xf32> to vector<15x128xf32>
    %19 = tpu.concatenate %18, %17 in 0 : vector<15x128xf32>, vector<1x128xf32> -> vector<16x128xf32>
    %20 = arith.addf %13, %19 : vector<16x128xf32>
    %c0_14 = arith.constant 0 : index
    %c0_15 = arith.constant 0 : index
    %21 = vector.load %arg3[%c0_14, %c0_15] : memref<1x128xf32, #tpu.memory_space<vmem>>, vector<1x128xf32>
    %22 = vector.broadcast %21 : vector<1x128xf32> to vector<16x128xf32>
    %23 = arith.addf %20, %22 : vector<16x128xf32>
    %cst_16 = arith.constant 0.000000e+00 : f32
    %24 = vector.broadcast %cst_16 : f32 to vector<16x128xf32>
    %25 = arith.maximumf %23, %24 : vector<16x128xf32>
    %26 = arith.truncf %25 : vector<16x128xf32> to vector<16x128xbf16>
    %cst_17 = arith.constant 0.000000e+00 : f32
    %27 = vector.broadcast %cst_17 : f32 to vector<16x128xf32>
    %c0_18 = arith.constant 0 : index
    %c0_19 = arith.constant 0 : index
    %c0_20 = arith.constant 0 : index
    %28 = vector.load %arg4[%c0_18, %c0_19, %c0_20] : memref<3x128x128xbf16, #tpu.memory_space<vmem>>, vector<1x128x128xbf16>
    %29 = vector.shape_cast %28 : vector<1x128x128xbf16> to vector<128x128xbf16>
    %cst_21 = arith.constant dense<0.000000e+00> : vector<16x128xf32>
    %30 = tpu.matmul %26, %29, %cst_21 {dimension_numbers = #tpu.dot_dimension_numbers<[1], [0], [0], [1], [0, 0, 1, 1], [], []>} : vector<16x128xbf16>, vector<128x128xbf16>, vector<16x128xf32> -> vector<16x128xf32>
    %cst_22 = arith.constant 0.000000e+00 : f32
    %31 = vector.broadcast %cst_22 : f32 to vector<1x128xf32>
    %32 = vector.extract_strided_slice %30 {offsets = [0, 0], sizes = [15, 128], strides = [1, 1]} : vector<16x128xf32> to vector<15x128xf32>
    %33 = tpu.concatenate %31, %32 in 0 : vector<1x128xf32>, vector<15x128xf32> -> vector<16x128xf32>
    %34 = arith.addf %27, %33 : vector<16x128xf32>
    %c1_23 = arith.constant 1 : index
    %c0_24 = arith.constant 0 : index
    %c0_25 = arith.constant 0 : index
    %35 = vector.load %arg4[%c1_23, %c0_24, %c0_25] : memref<3x128x128xbf16, #tpu.memory_space<vmem>>, vector<1x128x128xbf16>
    %36 = vector.shape_cast %35 : vector<1x128x128xbf16> to vector<128x128xbf16>
    %cst_26 = arith.constant dense<0.000000e+00> : vector<16x128xf32>
    %37 = tpu.matmul %26, %36, %cst_26 {dimension_numbers = #tpu.dot_dimension_numbers<[1], [0], [0], [1], [0, 0, 1, 1], [], []>} : vector<16x128xbf16>, vector<128x128xbf16>, vector<16x128xf32> -> vector<16x128xf32>
    %38 = arith.addf %34, %37 : vector<16x128xf32>
    %c2_27 = arith.constant 2 : index
    %c0_28 = arith.constant 0 : index
    %c0_29 = arith.constant 0 : index
    %39 = vector.load %arg4[%c2_27, %c0_28, %c0_29] : memref<3x128x128xbf16, #tpu.memory_space<vmem>>, vector<1x128x128xbf16>
    %40 = vector.shape_cast %39 : vector<1x128x128xbf16> to vector<128x128xbf16>
    %cst_30 = arith.constant dense<0.000000e+00> : vector<16x128xf32>
    %41 = tpu.matmul %26, %40, %cst_30 {dimension_numbers = #tpu.dot_dimension_numbers<[1], [0], [0], [1], [0, 0, 1, 1], [], []>} : vector<16x128xbf16>, vector<128x128xbf16>, vector<16x128xf32> -> vector<16x128xf32>
    %cst_31 = arith.constant 0.000000e+00 : f32
    %42 = vector.broadcast %cst_31 : f32 to vector<1x128xf32>
    %43 = vector.extract_strided_slice %41 {offsets = [1, 0], sizes = [15, 128], strides = [1, 1]} : vector<16x128xf32> to vector<15x128xf32>
    %44 = tpu.concatenate %43, %42 in 0 : vector<15x128xf32>, vector<1x128xf32> -> vector<16x128xf32>
    %45 = arith.addf %38, %44 : vector<16x128xf32>
    %c0_32 = arith.constant 0 : index
    %c0_33 = arith.constant 0 : index
    %46 = vector.load %arg5[%c0_32, %c0_33] : memref<1x128xf32, #tpu.memory_space<vmem>>, vector<1x128xf32>
    %47 = vector.broadcast %46 : vector<1x128xf32> to vector<16x128xf32>
    %48 = arith.addf %45, %47 : vector<16x128xf32>
    %c0_34 = arith.constant 0 : index
    %c0_35 = arith.constant 0 : index
    %49 = vector.load %arg6[%c0_34, %c0_35] : memref<64x128xbf16, #tpu.memory_space<vmem>>, vector<64x128xbf16>
    %cst_36 = arith.constant dense<0.000000e+00> : vector<16x128xf32>
    %50 = tpu.matmul %1, %49, %cst_36 {dimension_numbers = #tpu.dot_dimension_numbers<[1], [0], [0], [1], [0, 0, 1, 1], [], []>} : vector<16x64xbf16>, vector<64x128xbf16>, vector<16x128xf32> -> vector<16x128xf32>
    %51 = arith.addf %50, %48 : vector<16x128xf32>
    %cst_37 = arith.constant 0.000000e+00 : f32
    %52 = vector.broadcast %cst_37 : f32 to vector<16x128xf32>
    %53 = arith.maximumf %51, %52 : vector<16x128xf32>
    %c0_38 = arith.constant 0 : index
    %c0_39 = arith.constant 0 : index
    %c0_40 = arith.constant 0 : index
    %54 = vector.load %arg7[%c0_38, %c0_39, %c0_40] : memref<1x16x128xf32, #tpu.memory_space<vmem>>, vector<1x16x128xf32>
    %55 = vector.shape_cast %54 : vector<1x16x128xf32> to vector<16x128xf32>
    %56 = vector.shape_cast %53 : vector<16x128xf32> to vector<1x16x128xf32>
    tpu.vector_store %arg7[%c0_38, %c0_39, %c0_40], %56 {strides = array<i32>} : memref<1x16x128xf32, #tpu.memory_space<vmem>>, vector<1x16x128xf32>,
    return
  }
  func.func @transform_0(%arg0: i32) -> (i32, i32, i32) {
    %c0_i32 = arith.constant 0 : i32
    %c0_i32_0 = arith.constant 0 : i32
    %c0_i32_1 = arith.constant 0 : i32
    return %arg0, %c0_i32, %c0_i32_0 : i32, i32, i32
  }
  func.func @transform_1(%arg0: i32) -> (i32, i32, i32) {
    %c0_i32 = arith.constant 0 : i32
    %c0_i32_0 = arith.constant 0 : i32
    %c0_i32_1 = arith.constant 0 : i32
    %c0_i32_2 = arith.constant 0 : i32
    return %c0_i32, %c0_i32_0, %c0_i32_1 : i32, i32, i32
  }
  func.func @transform_2(%arg0: i32) -> (i32, i32) {
    %c0_i32 = arith.constant 0 : i32
    %c0_i32_0 = arith.constant 0 : i32
    %c0_i32_1 = arith.constant 0 : i32
    return %c0_i32, %c0_i32_0 : i32, i32
  }
  func.func @transform_3(%arg0: i32) -> (i32, i32, i32) {
    %c0_i32 = arith.constant 0 : i32
    %c0_i32_0 = arith.constant 0 : i32
    %c0_i32_1 = arith.constant 0 : i32
    %c0_i32_2 = arith.constant 0 : i32
    return %c0_i32, %c0_i32_0, %c0_i32_1 : i32, i32, i32
  }
  func.func @transform_4(%arg0: i32) -> (i32, i32) {
    %c0_i32 = arith.constant 0 : i32
    %c0_i32_0 = arith.constant 0 : i32
    %c0_i32_1 = arith.constant 0 : i32
    return %c0_i32, %c0_i32_0 : i32, i32
  }
  func.func @transform_5(%arg0: i32) -> (i32, i32) {
    %c0_i32 = arith.constant 0 : i32
    %c0_i32_0 = arith.constant 0 : i32
    %c0_i32_1 = arith.constant 0 : i32
    return %c0_i32, %c0_i32_0 : i32, i32
  }
  func.func @transform_6(%arg0: i32) -> (i32, i32, i32) {
    %c0_i32 = arith.constant 0 : i32
    %c0_i32_0 = arith.constant 0 : i32
    %c0_i32_1 = arith.constant 0 : i32
    return %arg0, %c0_i32, %c0_i32_0 : i32, i32, i32
  }
}

</mosaic_0001>

<bundles_post_ra>
// kernel: tpu_custom_call.1
= control target key start
LH: loop header
LB: loop body
LE: loop exit
PB: predicated region body
PF: predicated region fallthrough
CT: control target
= control target key end

     0   :  { %11 = vsyncpa [#allocation3], 0  ;;  %s1683_s0 = inlined_call_operand.hbm [shape: bf16[2,16,64], index: 0, kind: input, shape index: {}]   ;;  %s1684_s1 = inlined_call_operand.hbm [shape: bf16[3,64,128], index: 1, kind: input, shape index: {}]   ;;  %s1685_s2 = inlined_call_operand.vmem [shape: f32[1,128], index: 2, kind: input, shape index: {}]   ;;  %s1686_s3 = inlined_call_operand.hbm [shape: bf16[3,128,128], index: 3, kind: input, shape index: {}]   ;;  %s1687_s4 = inlined_call_operand.vmem [shape: f32[1,128], index: 4, kind: input, shape index: {}]   ;;  %s1688_s5 = inlined_call_operand.hbm [shape: bf16[64,128], index: 5, kind: input, shape index: {}]   ;;  %s1689_s6 = inlined_call_operand.hbm [shape: f32[2,16,128], index: 6, kind: output, shape index: {}]  }
   0x1   :  { %13 = vsyncpa [#allocation3 + $0x1], 0 }
   0x2   :  { %14 = vsyncpa [#allocation6], 0 }
   0x3   :  { %15 = vsyncpa [#allocation9], 0 }
   0x4   :  { %16 = vsyncpa [#allocation4], 0 }
   0x5   :  { %18 = vsyncpa [#allocation4 + $0x1], 0  ;;  %s1491_s21 = smov 0   ;;  %s1493_s22 = smov 0  }
   0x6   :  { %s1495_s23 = smov 0   ;;  %s1497_s24 = smov 0  }
   0x7 LB: > { %s1512_s25 = sadd.s32 4294967295, %s1447_s24   ;;  %s939_s26 = sadd.s32 4294967294, %s1447_s24   ;;  %s1447_s24 = sphi %s1497_s24, %s1704_s24   ;;  %s1443_s23 = sphi %s1495_s23, %s1703_s23   ;;  %s1439_s22 = sphi %s1493_s22, %s1702_s22   ;;  %s1435_s21 = sphi %s1491_s21, %s1701_s21  }
   0x8   : > { %p44_p0 = scmp.ne.s32.totalorder %s1439_s22, %s1435_s21  ;;  %p45_p1 = scmp.eq.s32.totalorder %s1512_s25, 0 }
   0x9   : > { %p173_p2 = scmp.eq.s32.totalorder %s1512_s25, 1  ;;  %p179_p3 = scmp.eq.s32.totalorder %s939_s26, 1 }
   0xa   : > { %p1521_p4 = por %p45_p1, %p44_p0  ;;  %p940_p5 = scmp.ge.s32.totalorder %s1447_s24, 1 }
   0xb   : > { %p1526_p6 = por %p179_p3, %p44_p0  ;;  %p186_p7 = scmp.lt.s32.totalorder %s1447_s24, 3 }
   0xc   : > { %s197_s7 = sshll.u32 %s1684_s1, 4  ;;  %s1449_s9 = smov [#allocation5]   ;;  %s198_s7 = int_to_ptr.hbm [resolvable:$true] %s197_s7 }
   0xd   : > { %p1534_p8 = pnand %p940_p5, %p186_p7  ;;  %s199_s10 = sshll.u32 %s1449_s9, 4  ;;  %s200_s10 = int_to_ptr.vmem [resolvable:$true] %s199_s10 }
   0xe   : > { %s214_s14 = sshll.u32 %s1686_s3, 4  ;;  %s1690_s15 = smov 64   ;;  %s215_s14 = int_to_ptr.hbm [resolvable:$true] %s214_s14 }
   0xf   : > { %p1186_p9 = pneg %p1534_p8  ;;  %s1691_s16 = smov 4  }
  0x10   : > { %s1452_s17 = smov [#allocation7]   ;;  %s231_s26 = sshll.u32 %s1688_s5, 4  ;;  %s232_s26 = int_to_ptr.hbm [resolvable:$true] %s231_s26 }
  0x11   : > { %p1542_p10 = pnand %p1186_p9, %p45_p1  ;;  %s216_s18 = sshll.u32 %s1452_s17, 4  ;;  %s217_s18 = int_to_ptr.vmem [resolvable:$true] %s216_s18 }
  0x12   : > { %s1453_s29 = smov [#allocation8]   ;;  %p38_p13 = scmp.ne.s32.totalorder %s1443_s23, %s1439_s22 }
  0x13   : > { %1189 = dma.hbm_to_vmem [thread:$0]  (!%p1542_p10), %s198_s7, 1536, %s200_s10, [#allocation6], %s1690_s15, %s1690_s15, %s1691_s16  }
  0x14   : > { %1192 = dma.hbm_to_vmem [thread:$0]  (!%p1542_p10), %s215_s14, 3072, %s217_s18, [#allocation6], %s1690_s15, %s1690_s15, %s1691_s16  }
  0x15   : > { %s233_s30 = sshll.u32 %s1453_s29, 4  ;;  %s1564_s7 = sadd.s32 1, %s1447_s24   ;;  %s234_s30 = int_to_ptr.vmem [resolvable:$true] %s233_s30 }
  0x16   : > { %1195 = dma.hbm_to_vmem [thread:$0]  (!%p1542_p10), %s232_s26, 512, %s234_s30, [#allocation9], %s1690_s15, %s1690_s15, %s1691_s16  }
  0x17   : > { %s28_s9 = ssub.s32 %s1447_s24, %s1564_s7  ;;  %s31_s10 = sadd.s32 1, %s1443_s23 }
  0x18   : > { %p29_p12 = scmp.eq.s32.totalorder %s28_s9, 0  ;;  %p39_p0 = scmp.eq.s32.totalorder %s1447_s24, 0 }
  0x19   : > { %p1582_p3 = por %p173_p2, %p38_p13  ;;  %p1207_p5 = scmp.lt.s32.totalorder %s1447_s24, 2 }
  0x1a   : > { %s1578_s12 = scalar_select %p29_p12, %s1443_s23, %s31_s10  }
  0x1b   : > { %s247_s14 = sand.u32 1, %s1443_s23   ;;  %s1127_s11 = sshll.u32 %s1447_s24, 3 }
  0x1c   : > { %p40_p7 = por %p39_p0, %p38_p13  ;;  %s945_s17 = sshll.u32 %s247_s14, 3 }
  0x1d   : > { %s256_s20 = scalar_lea.hbm %s1683_s0, %s1127_s11  ;;  %s251_s29 = scalar_lea.vmem [#allocation2], %s945_s17 }
  0x1e   : > { %s257_s26 = sshll.u32 %s256_s20, 4  ;;  %s259_s30 = sshll.u32 %s251_s29, 4  ;;  %s258_s26 = int_to_ptr.hbm [resolvable:$true] %s257_s26  ;;  %s260_s30 = int_to_ptr.vmem [resolvable:$true] %s259_s30 }
  0x1f   : > { %p1592_p9 = pnand %p1207_p5, %p40_p7  ;;  %s248_s10 = scalar_lea.sflag [#allocation3], %s247_s14 }
  0x20   : > { %s1343_s15 = sshra.s32 %s258_s26, 4  ;;  %s1350_s17 = scalar_lea.hbm %s1683_s0, 16  ;;  %s1344_s15 = int_to_ptr.hbm [resolvable:$true] %s1343_s15 }
  0x21   : > { %s1345_s16 = scalar_lea.hbm %s1344_s15, 8  ;;  %p1347_p10 = pneg %p1592_p9 }
  0x22   : > { %p1346_p2 = scmp.ne.s32.totalorder %s1344_s15, %s1345_s16  ;;  %p1351_p0 = scmp.lt.s32.totalorder %s1344_s15, %s1683_s0 }
  0x23   : > { %p1352_p5 = scmp.lt.s32.totalorder %s1350_s17, %s1345_s16 }
  0x24   : > { %p1348_p12 = pnand %p1347_p10, %p1346_p2 }
  0x25   : > { %p1353_p7 = por %p1352_p5, %p1351_p0 }
  0x26   : > { %p1349_p13 = pneg %p1348_p12 }
  0x28   : > { %p1354_p11 = pnand %p1353_p7, %p1349_p13 }
  0x2a   : > { %1357 = shalt.err (!%p1354_p11)
}
  0x2b   : > { %s1698_s14 = smov 4   ;;  %s1699_s29 = smov 64  }
  0x2c   : > { %1199 = dma.hbm_to_vmem [thread:$0]  (!%p1592_p9), %s258_s26, 128, %s260_s30, %s248_s10, %s1699_s29, %s1699_s29, %s1698_s14  }
  0x2d   : > { %271 = sbr.rel (%p1534_p8) target bundleno = 381 (0x17d), region = 44  ;;  %s1612_s11 = sand.u32 (!%p1534_p8), 1, %s1439_s22  }
  0x2e   : > { %s949_s15 = sshll.u32 (!%p1534_p8), %s1612_s11, 3  ;;  %s274_s16 = scalar_lea.sflag (!%p1534_p8), [#allocation3], %s1612_s11 }
  0x2f   : > { %s1616_s18 = scalar_lea.vmem (!%p1534_p8), [#allocation2], %s949_s15 }
  0x32   : > { %1418 = dma.done.wait (%p1521_p4), %s274_s16, 128  }
  0x33   : > { %1420 = vsyncadd (%p1521_p4), %s274_s16, 4294967168 }
  0x34   : > { %1422 = dma.done.wait (%p45_p1), [#allocation6], 4608  }
  0x35   : > { %1424 = vsyncadd (%p45_p1), [#allocation6], 4294962688 }
  0x36   : > { %1426 = dma.done.wait (%p45_p1), [#allocation9], 512  }
  0x37   : > { %1428 = vsyncadd (%p45_p1), [#allocation9], 4294966784  ;;  %v1132_v0 = vld [vmem:[#allocation5 + $0x18] sm:$0xff]  ;;  %v1131_v3 = vld [vmem:[#allocation5 + $0x10] sm:$0xff]  ;;  %vm362_vm0 = vcmask 523264   ;;  %vm382_vm1 = vcmask 1040384  }
  0x38   : > { %v1136_v1 = vld [vmem:[#allocation5 + $0x38] sm:$0xff]  ;;  %370 = vmatpush.bf16.msra.mxu0 %v1132_v0  ;;  %v1135_v4 = vld [vmem:[#allocation5 + $0x30] sm:$0xff]  ;;  %v1130_v7 = vld [vmem:[#allocation5 + $0x8] sm:$0xff]  ;;  %vm489_vm2 = vcmask 1046528   ;;  %s953_s9 = sshll.u32 %s1612_s11, 4  ;;  %s1169_s10 = sshll.u32 %s1512_s25, 4 }
  0x39   : > { %v1140_v2 = vld [vmem:[#allocation5 + $0x58] sm:$0xff]  ;;  %428 = vmatpush.bf16.msra.mxu1 %v1136_v1  ;;  %v1139_v5 = vld [vmem:[#allocation5 + $0x50] sm:$0xff]  ;;  %v1134_v8 = vld [vmem:[#allocation5 + $0x28] sm:$0xff]  ;;  %s833_s20 = scalar_lea.hbm %s1689_s6, %s1169_s10  ;;  %s321_s14 = scalar_lea.vmem [#allocation10], %s953_s9 }
  0x3a   : > { %477 = vmatpush.bf16.msra.mxu2 %v1140_v2  ;;  %v1148_v6 = vld [vmem:[#allocation7 + $0x38] sm:$0xff]  ;;  %v1138_v9 = vld [vmem:[#allocation5 + $0x48] sm:$0xff]  ;;  %v1147_v10 = vld [vmem:[#allocation7 + $0x30] sm:$0xff]  ;;  %s834_s29 = sshll.u32 %s321_s14, 4  ;;  %s836_s25 = sshll.u32 %s833_s20, 4  ;;  %s835_s29 = int_to_ptr.vmem [resolvable:$true] %s834_s29  ;;  %s837_s25 = int_to_ptr.hbm [resolvable:$true] %s836_s25 }
  0x3b   : > { %571 = vmatpush.bf16.msra.mxu3 %v1148_v6  ;;  %v1129_v11 = vld [vmem:[#allocation5] sm:$0xff]  ;;  %v1156_v14 = vld [vmem:[#allocation7 + $0x78] sm:$0xff]  ;;  %v1155_v17 = vld [vmem:[#allocation7 + $0x70] sm:$0xff]  ;;  %s822_s15 = scalar_lea.sflag [#allocation4], %s1612_s11  ;;  %s1387_s16 = sshra.s32 %s837_s25, 4  ;;  %s1388_s16 = int_to_ptr.hbm [resolvable:$true] %s1387_s16 }
  0x3c   : > { %371 = vmatpush.bf16.msra.mxu0 %v1131_v3  ;;  %v1133_v12 = vld [vmem:[#allocation5 + $0x20] sm:$0xff]  ;;  %v1164_v15 = vld [vmem:[#allocation7 + $0xb8] sm:$0xff]  ;;  %v1163_v18 = vld [vmem:[#allocation7 + $0xb0] sm:$0xff]  ;;  %s1393_s26 = scalar_lea.hbm %s1689_s6, 32  ;;  %p1394_p11 = scmp.lt.s32.totalorder %s1388_s16, %s1689_s6 }
  0x3d   : > { %429 = vmatpush.bf16.msra.mxu1 %v1135_v4  ;;  %v1137_v13 = vld [vmem:[#allocation5 + $0x40] sm:$0xff]  ;;  %v1128_v16 = vld [vmem:[%s1616_s18] sm:$0xff]  ;;  %v1146_v19 = vld [vmem:[#allocation7 + $0x28] sm:$0xff]  ;;  %s1389_s18 = scalar_lea.hbm %s1388_s16, 16 }
  0x3e   : > { %478 = vmatpush.bf16.msra.mxu2 %v1139_v5  ;;  %v1154_v20 = vld [vmem:[#allocation7 + $0x68] sm:$0xff]  ;;  %v1145_v22 = vld [vmem:[#allocation7 + $0x20] sm:$0xff]  ;;  %v1144_v25 = vld [vmem:[#allocation7 + $0x18] sm:$0xff]  ;;  %p1390_p1 = scmp.ne.s32.totalorder %s1388_s16, %s1389_s18  ;;  %p1395_p9 = scmp.lt.s32.totalorder %s1393_s26, %s1389_s18 }
  0x3f   : > { %572 = vmatpush.bf16.msra.mxu3 %v1147_v10  ;;  %v1162_v21 = vld [vmem:[#allocation7 + $0xa8] sm:$0xff]  ;;  %v1153_v23 = vld [vmem:[#allocation7 + $0x60] sm:$0xff]  ;;  %v1152_v26 = vld [vmem:[#allocation7 + $0x58] sm:$0xff] }
  0x40   : > { %372 = vmatpush.bf16.msra.mxu0 %v1130_v7  ;;  %v1161_v24 = vld [vmem:[#allocation7 + $0xa0] sm:$0xff]  ;;  %v1160_v27 = vld [vmem:[#allocation7 + $0x98] sm:$0xff]  ;;  %v1143_v29 = vld [vmem:[#allocation7 + $0x10] sm:$0xff]  ;;  %p1391_p4 = pnand %p1390_p1, %p1582_p3  ;;  %p1396_p2 = por %p1395_p9, %p1394_p11 }
  0x41   : > { %430 = vmatpush.bf16.msra.mxu1 %v1134_v8  ;;  %v1168_v28 = vld [vmem:[#allocation8 + $0x18] sm:$0xff]  ;;  %v1151_v30 = vld [vmem:[#allocation7 + $0x50] sm:$0xff]  ;;  %v1142_v33 = vld [vmem:[#allocation7 + $0x8] sm:$0xff] }
  0x42   : > { %479 = vmatpush.bf16.msra.mxu2 %v1138_v9  ;;  %v1159_v31 = vld [vmem:[#allocation7 + $0x90] sm:$0xff]  ;;  %v1150_v34 = vld [vmem:[#allocation7 + $0x48] sm:$0xff]  ;;  %v1141_v37 = vld [vmem:[#allocation7] sm:$0xff]  ;;  %p1392_p8 = pneg %p1391_p4 }
  0x43   : > { %573 = vmatpush.bf16.msra.mxu3 %v1146_v19  ;;  %v1167_v32 = vld [vmem:[#allocation8 + $0x10] sm:$0xff]  ;;  %v1158_v35 = vld [vmem:[#allocation7 + $0x88] sm:$0xff]  ;;  %v1149_v38 = vld [vmem:[#allocation7 + $0x40] sm:$0xff] }
  0x44   : > { %373 = vmatpush.bf16.msra.mxu0 %v1129_v11  ;;  %v1166_v36 = vld [vmem:[#allocation8 + $0x8] sm:$0xff]  ;;  %v1157_v39 = vld [vmem:[#allocation7 + $0x80] sm:$0xff]  ;;  %v1251_v55 = vld [vmem:[%s1685_s2] ss:$0 sm:$0xff]  ;;  %p1397_p10 = pnand %p1396_p2, %p1392_p8 }
  0x45   : > { %431 = vmatpush.bf16.msra.mxu1 %v1133_v12  ;;  %v1165_v40 = vld [vmem:[#allocation8] sm:$0xff]  ;;  %v1252_v10 = vld [vmem:[%s1687_s4] ss:$0 sm:$0xff] }
  0x46   : > { %480 = vmatpush.bf16.msra.mxu2 %v1137_v13 }
  0x47   : > { %974 = vmatmul.msk.bf16.vlgmr.msra.gmra.mxu0 %vm362_vm0, %v1128_v16  ;;  %574 = vmatpush.bf16.msra.mxu3 %v1145_v22 }
  0x48   : > { %660 = vmatpush.bf16.msrb.mxu0 %v1156_v14  ;;  %991 = vmatmul.msk.bf16.vlgmr.msra.gmra.mxu1 %vm362_vm0, %v1128_v16 }
  0x49   : > { %741 = vmatpush.bf16.msrb.mxu1 %v1164_v15  ;;  %1008 = vmatmul.msk.bf16.vlgmr.msra.gmra.mxu2 %vm362_vm0, %v1128_v16 }
  0x4a   : > { %807 = vmatpush.bf16.msrb.mxu2 %v1168_v28 }
  0x4b   : > { %575 = vmatpush.bf16.msra.mxu3 %v1144_v25 }
  0x4c   : > { %661 = vmatpush.bf16.msrb.mxu0 %v1155_v17 }
  0x4d   : > { %742 = vmatpush.bf16.msrb.mxu1 %v1163_v18 }
  0x4e   : > { %808 = vmatpush.bf16.msrb.mxu2 %v1167_v32 }
  0x4f   : > { %576 = vmatpush.bf16.msra.mxu3 %v1143_v29 }
  0x50   : > { %662 = vmatpush.bf16.msrb.mxu0 %v1154_v20 }
  0x51   : > { %743 = vmatpush.bf16.msrb.mxu1 %v1162_v21 }
  0x52   : > { %809 = vmatpush.bf16.msrb.mxu2 %v1166_v36 }
  0x53   : > { %577 = vmatpush.bf16.msra.mxu3 %v1142_v33 }
  0x54   : > { %663 = vmatpush.bf16.msrb.mxu0 %v1153_v23 }
  0x55   : > { %744 = vmatpush.bf16.msrb.mxu1 %v1161_v24 }
  0x56   : > { %810 = vmatpush.bf16.msrb.mxu2 %v1165_v40 }
  0x57   : > { %578 = vmatpush.bf16.msra.mxu3 %v1141_v37 }
  0x58   : > { %664 = vmatpush.bf16.msrb.mxu0 %v1152_v26 }
  0x59   : > { %745 = vmatpush.bf16.msrb.mxu1 %v1160_v27  ;;  %1121 = vmatmul.msk.bf16.vlgmr.msrb.gmra.mxu2 %vm362_vm0, %v1128_v16 }
  0x5c   : > { %665 = vmatpush.bf16.msrb.mxu0 %v1151_v30 }
  0x5d   : > { %746 = vmatpush.bf16.msrb.mxu1 %v1159_v31 }
  0x60   : > { %666 = vmatpush.bf16.msrb.mxu0 %v1150_v34 }
  0x61   : > { %747 = vmatpush.bf16.msrb.mxu1 %v1158_v35 }
  0x64   : > { %667 = vmatpush.bf16.msrb.mxu0 %v1149_v38 }
  0x65   : > { %748 = vmatpush.bf16.msrb.mxu1 %v1157_v39 }
  0xc4   : > { %v375_v41 = vpop.f32.mrf.mxu0 }
  0xc5   : > { %v433_v42 = vpop.f32.mrf.mxu1  ;;  %v383_v45 = vrot.slane %v375_v41, 7 }
  0xc7   : > { %v388_v47 = vsel %vm382_vm1, 0.0, %v383_v45 }
  0xc8   : > { %v438_v53 = vadd.f32 %v433_v42, %v388_v47 }
  0xcc   : > { %v482_v43 = vpop.f32.mrf.mxu2  ;;  %v377_v44 = vpop.f32.mrf.mxu0 }
  0xcd   : > { %v384_v46 = vrot.slane %v377_v44, 7  ;;  %v490_v50 = vrot.slane %v482_v43, 1  ;;  %v435_v51 = vpop.f32.mrf.mxu1 }
  0xcf   : > { %v385_v48 = vsel %vm382_vm1, %v383_v45, %v384_v46 }
  0xd0   : > { %v439_v54 = vadd.f32 %v435_v51, %v385_v48 }
  0xd4   : > { %v484_v49 = vpop.f32.mrf.mxu2 }
  0xd5   : > { %v491_v52 = vrot.slane %v484_v49, 1 }
  0xd7   : > { %v492_v56 = vsel %vm489_vm2, %v490_v50, %v491_v52  ;;  %v495_v57 = vsel %vm489_vm2, %v491_v52, 0.0 }
  0xd8   : > { %v496_v58 = vadd.f32 %v492_v56, %v438_v53  ;;  %v497_v59 = vadd.f32 %v495_v57, %v439_v54 }
  0xda   : > { %v503_v60 = vadd.f32 %v1251_v55, %v497_v59  ;;  %v502_v61 = vadd.f32 %v1251_v55, %v496_v58 }
  0xdc   : > { %v504_v62 = vmax.f32 %v502_v61, 0.0  ;;  %v505_v63 = vmax.f32 %v503_v60, 0.0  ;;  %v812_v12 = vpop.f32.mrf.mxu2 }
  0xde   : > { %v506_v0 = vpack.c.bf16 %v505_v63, %v504_v62 }
  0xe0   : > { %579 = vmatmul.bf16.vlgmr.msra.gmra.mxu3 %v506_v0  ;;  %668 = vmatmul.bf16.vlgmr.msrb.gmra.mxu0 %v506_v0 }
  0xe1   : > { %749 = vmatmul.bf16.vlgmr.msrb.gmra.mxu1 %v506_v0 }
  0xe4   : > { %v814_v25 = vpop.f32.mrf.mxu2 }
 0x15d   : > { %v669_v3 = vpop.f32.mrf.mxu0 }
 0x15e   : > { %v750_v1 = vpop.f32.mrf.mxu1 }
 0x15f   : > { %v757_v7 = vrot.slane %v750_v1, 1 }
 0x163   : > { %v580_v2 = vpop.f32.mrf.mxu3 }
 0x164   : > { %v587_v4 = vrot.slane %v580_v2, 7 }
 0x165   : > { %v671_v17 = vpop.f32.mrf.mxu0 }
 0x166   : > { %v592_v5 = vsel %vm382_vm1, 0.0, %v587_v4  ;;  %v752_v6 = vpop.f32.mrf.mxu1 }
 0x167   : > { %v674_v8 = vadd.f32 %v669_v3, %v592_v5  ;;  %v758_v9 = vrot.slane %v752_v6, 1 }
 0x169   : > { %v759_v11 = vsel %vm489_vm2, %v757_v7, %v758_v9  ;;  %v762_v21 = vsel %vm489_vm2, %v758_v9, 0.0 }
 0x16a   : > { %v763_v13 = vadd.f32 %v759_v11, %v674_v8 }
 0x16b   : > { %v582_v14 = vpop.f32.mrf.mxu3 }
 0x16c   : > { %v588_v15 = vrot.slane %v582_v14, 7  ;;  %v769_v16 = vadd.f32 %v1252_v10, %v763_v13 }
 0x16e   : > { %v589_v18 = vsel %vm382_vm1, %v587_v4, %v588_v15  ;;  %v813_v19 = vadd.f32 %v812_v12, %v769_v16 }
 0x16f   : > { %v675_v20 = vadd.f32 %v671_v17, %v589_v18 }
 0x170   : > { %v817_v22 = vmax.f32 %v813_v19, 0.0 }
 0x171   : > { %v764_v23 = vadd.f32 %v762_v21, %v675_v20 }
 0x172   : > { %819 = vst [vmem:[%s321_s14] sm:$0xff] %v817_v22 }
 0x173   : > { %v770_v24 = vadd.f32 %v1252_v10, %v764_v23 }
 0x175   : > { %v815_v26 = vadd.f32 %v814_v25, %v770_v24 }
 0x177   : > { %v818_v27 = vmax.f32 %v815_v26, 0.0 }
 0x179   : > { %820 = vst [vmem:[%s321_s14 + $0x8] sm:$0xff] %v818_v27 }
 0x17a   : > { %1400 = shalt.err (!%p1397_p10)
}
 0x17b   : > { %s1454_s11 = smov 128   ;;  %s1455_s10 = smov 8  }
 0x17c   : > { %1184 = dma.vmem_to_hbm [thread:$0]  (%p1582_p3), %s835_s29, 256, %s837_s25, %s822_s15, %s1454_s11, %s1454_s11, %s1455_s10  }
 0x17d PF: > { %s851_s17 = sand.u32 1, %s1435_s21   ;;  %p1700_p12 = scmp.ge.s32.totalorder %s1447_s24, 2 }
 0x17e   : > { %s852_s19 = scalar_lea.sflag [#allocation4], %s851_s17 }
 0x17f   : > { %p1201_p13 = pnand %p1700_p12, %p1526_p6 }
 0x181   : > { %p1202_p0 = pneg %p1201_p13 }
 0x183   : > { %1430 = dma.done.wait (%p1202_p0), %s852_s19, 256  }
 0x184   : > { %1432 = vsyncadd (%p1202_p0), %s852_s19, 4294967040  ;;  %p21_p5 = scmp.ge.s32.totalorder %s1564_s7, 4   ;;  %s1701_s21 = smov %s1439_s22 }
 0x185   : > { %s1702_s22 = smov %s1443_s23  ;;  %s1703_s23 = smov %s1578_s12 }
 0x186   : > { %s1704_s24 = smov %s1564_s7  ;;  %23 = sbr.rel (!%p21_p5) target bundleno = 7 (0x7), region = 105 }
 0x18b   :  { %858 = vsyncpa [#allocation3], 1 }
 0x18c   :  { %860 = vsyncpa [#allocation3 + $0x1], 1 }
 0x18d   :  { %861 = vsyncpa [#allocation6], 1 }
 0x18e   :  { %862 = vsyncpa [#allocation9], 1 }
 0x18f   :  { %863 = vsyncpa [#allocation4], 1 }
 0x190   :  { %865 = vsyncpa [#allocation4 + $0x1], 1 }

</bundles_post_ra>
